<compile_context>
chip_gen: v7x
topology: tpu7x:2x2x1
jax: 0.10.0
libtpu: 0.0.40
codegen_flags: <defaults>
</compile_context>

<pallas_src>
import math
from functools import lru_cache, partial
from typing import NamedTuple

import numpy as np
import jax
import jax.numpy as jnp
from jax import lax
from jax.experimental import pallas as pl
from jax.experimental.pallas import tpu as pltpu


# --------------------------------------------------------------------------
# Host-side filter setup (vectorized numpy, cached per rate pair)
# --------------------------------------------------------------------------
@lru_cache(maxsize=None)
def polyphase_sinc_kernel(orig_freq, new_freq, lowpass_filter_width=6, rolloff=0.99):
    """torchaudio 'sinc_interp_hann' polyphase kernel, gcd-reduced.

    Returns (kernel[n, K] float32, width, o, n) such that
        y[i*n + j] = sum_k kernel[j, k] * x_padded[i*o + k],
    where x_padded = [0]*width ++ x ++ zeros.
    """
    if orig_freq == new_freq:
        return np.ones((1, 1), dtype=np.float32), 0, 1, 1
    g = math.gcd(int(orig_freq), int(new_freq))
    o, n = int(orig_freq) // g, int(new_freq) // g
    base_freq = min(o, n) * rolloff
    width = int(math.ceil(lowpass_filter_width * o / base_freq))
    idx = np.arange(-width, width + o, dtype=np.float64)[None, :] / o
    t = np.arange(0, -n, -1, dtype=np.float64)[:, None] / n + idx
    t = np.clip(t * base_freq, -lowpass_filter_width, lowpass_filter_width)
    window = np.cos(t * math.pi / lowpass_filter_width / 2) ** 2
    t = t * math.pi
    safe_t = np.where(t == 0.0, 1.0, t)
    kernel = np.where(t == 0.0, 1.0, np.sin(safe_t) / safe_t) * window * (base_freq / o)
    return kernel.astype(np.float32), width, o, n


def plc_source_indices(received, loss_behavior="plc"):
    """src[f] = frame whose decoded samples output frame f carries (-1 -> silence)."""
    received = np.asarray(received).astype(bool)
    idx = np.arange(received.shape[0], dtype=np.int32)
    src = np.where(received, idx, np.int32(-1)).astype(np.int32)
    if loss_behavior == "plc":
        src = np.maximum.accumulate(src)
    # TODO(synk): 'noise' loss_behavior draws per-frame host RNG noise; lost
    # frames fall back to silence here (same as 'zero').
    return src.astype(np.int32)


def _banded_resample_matrix(kernel, o, n, C):
    """Constant f32 matrix M (Wp, C): out[a*C + b] = sum_w x_pad[a*S + w] * M[w, b]."""
    K = kernel.shape[1]
    S = (C // n) * o                      # input samples consumed per canvas row
    W = S - o + K                         # input window per canvas row (S + 2*width)
    Wp = -(-W // 8) * 8                   # sublane-friendly
    M = np.zeros((Wp, C), np.float32)     # f32 coefficients (review: no bf16)
    for b in range(C):
        j = b % n
        base = (b // n) * o
        M[base:base + K, b] = kernel[j]
    return M, S, W, Wp


class _Stage(NamedTuple):
    o: int
    n: int
    width: int
    C: int        # canvas lane width (multiple of 256 and of n)
    S: int        # input stride per canvas row (multiple of 128)
    W: int
    Wp: int
    rpt: int      # canvas rows per grid step (multiple of 8)
    A_pad: int    # total canvas rows (multiple of rpt)


class _Cfg(NamedTuple):
    T: int
    Td: int
    fs: int
    num_pkts: int
    Tu: int
    down: _Stage
    up: _Stage


def _plan_stage(orig_freq, new_freq, out_len):
    kern, width, o, n = polyphase_sinc_kernel(orig_freq, new_freq)
    C = max(256, 128 * n)                         # 256-aligned lanes, divisible by n
    M, S, W, Wp = _banded_resample_matrix(kern, o, n, C)
    A = -(-out_len // C)                          # canvas rows needed
    A8 = -(-A // 8) * 8
    rpt = max(8, ((4096 // C) // 8) * 8)          # ~4K output samples per grid step
    rpt = min(rpt, A8)
    A_pad = -(-A8 // rpt) * rpt
    return _Stage(o=o, n=n, width=width, C=C, S=S, W=W, Wp=Wp,
                  rpt=rpt, A_pad=A_pad), M


# --------------------------------------------------------------------------
# Pallas kernel: one banded-matrix MXU matmul per canvas tile
# --------------------------------------------------------------------------
def _resample_canvas_kernel(xw_ref, m_ref, o_ref, *, lanes, rpt, valid_len, quantize):
    # (rpt, Wp) x (Wp, C) -> (rpt, C): output is already lane-dense, row-major
    # sample order (phase interleave baked into M -> no transposes anywhere).
    y = jnp.dot(xw_ref[...], m_ref[...], preferred_element_type=jnp.float32)
    if quantize:
        # Opus codec modeled as the int16 PCM round trip it implies
        # (encode: *32767, trunc-toward-zero int cast; decode: /32767).
        q = jnp.clip(y * 32767.0, -32768.0, 32767.0)
        y = q.astype(jnp.int32).astype(jnp.float32) * (1.0 / 32767.0)
    a = lax.broadcasted_iota(jnp.int32, y.shape, 0)
    b = lax.broadcasted_iota(jnp.int32, y.shape, 1)
    idx = (pl.program_id(0) * rpt + a) * lanes + b
    # zero the zero-byte padding of the final packet (idx >= Td) and the
    # canvas padding; applied BEFORE PLC, exactly like the reference order.
    o_ref[...] = jnp.where(idx < valid_len, y, 0.0)


def _resample_canvas(xwin, m, *, rpt, lanes, valid_len, quantize):
    a_pad, wp = xwin.shape
    body = partial(_resample_canvas_kernel, lanes=lanes, rpt=rpt,
                   valid_len=valid_len, quantize=quantize)
    return pl.pallas_call(
        body,
        grid=(a_pad // rpt,),
        in_specs=[pl.BlockSpec((rpt, wp), lambda t: (t, 0)),      # chunk+halo rows
                  pl.BlockSpec((wp, lanes), lambda t: (0, 0))],   # resident f32 filter
        out_specs=pl.BlockSpec((rpt, lanes), lambda t: (t, 0)),
        out_shape=jax.ShapeDtypeStruct((a_pad, lanes), jnp.float32),
        compiler_params=pltpu.CompilerParams(
            dimension_semantics=("parallel",),        # substantial tiles -> v7x megacore
            vmem_limit_bytes=32 * 1024 * 1024),       # blocks are <~2 MB; v7x-safe
    )(xwin, m)


# --------------------------------------------------------------------------
# Device pipeline (jitted per static config)
# --------------------------------------------------------------------------
def _windowed_rows(x, st: _Stage):
    """Xwin[a, w] = x_pad[a*S + w]: contiguous chunk + 2*width halo (~1.1x stream)."""
    total = (st.A_pad + 1) * st.S
    assert total >= st.width + x.shape[0]
    xp = jnp.pad(x, (st.width, total - st.width - x.shape[0]))
    main = xp[: st.A_pad * st.S].reshape(st.A_pad, st.S)
    halo_cols = st.W - st.S                                   # = 2*width
    if halo_cols > 0:
        halo = xp[st.S: st.S + st.A_pad * st.S].reshape(st.A_pad, st.S)[:, :halo_cols]
        xw = jnp.concatenate([main, halo], axis=1)
    else:
        xw = main
    if st.Wp > st.W:
        xw = jnp.pad(xw, ((0, 0), (0, st.Wp - st.W)))
    return xw


@partial(jax.jit, static_argnames=("cfg",))
def _opus_device(x, src, m_down, m_up, *, cfg: _Cfg):
    L_dec = cfg.num_pkts * cfg.fs

    # 1) downsample + int16 PCM round trip + last-packet zero padding (fused),
    #    lane-dense canvas tiles of ~4K samples each.
    xw_d = _windowed_rows(x, cfg.down)
    canv = _resample_canvas(xw_d, m_down, rpt=cfg.down.rpt, lanes=cfg.down.C,
                            valid_len=cfg.Td, quantize=True)
    dec = canv.reshape(-1)[:L_dec].reshape(cfg.num_pkts, cfg.fs)   # free reshape

    # 2) packet-loss concealment: tiny gather on the small decoded frames
    #    (review: "tiny second pallas_call ... or jnp.take").  src < 0 -> silence.
    keep = (src >= 0)[:, None]
    z = jnp.where(keep, jnp.take(dec, jnp.maximum(src, 0), axis=0), 0.0).reshape(-1)

    # 3) upsample back to the original rate, same banded-matmul formulation.
    xw_u = _windowed_rows(z, cfg.up)
    up = _resample_canvas(xw_u, m_up, rpt=cfg.up.rpt, lanes=cfg.up.C,
                          valid_len=cfg.Tu, quantize=False)
    up = up.reshape(-1)[:cfg.Tu]

    # 4) _fix_length
    if cfg.Tu < cfg.T:
        up = jnp.pad(up, (0, cfg.T - cfg.Tu))
    else:
        up = up[:cfg.T]
    return up[None, :]


# --------------------------------------------------------------------------
# OpusAugment.forward equivalent
# --------------------------------------------------------------------------
def opus_augment_forward(waveform, received, *, sample_rate, frame_duration_ms,
                         bps, plr, loss_behavior="plc"):
    """Returns (decoded, bps, plr, target_sr, received) like OpusAugment.forward.

    TODO(synk): bps==0 / plr<0 / received=None use host RNG (random.randint,
    Gilbert-Elliot) in the reference; explicit values must be supplied here.
    """
    waveform = jnp.asarray(waveform, jnp.float32)
    assert waveform.ndim == 2 and waveform.shape[0] == 1, "mono (1, T) waveform expected"
    T = int(waveform.shape[-1])

    # _bps_to_rate
    if bps < 12000:
        target_sr = 8000
    elif bps < 15000:
        target_sr = 12000
    else:
        target_sr = 16000
    fs = int((frame_duration_ms / 1000.0) * target_sr)

    _, _, o_d, n_d = polyphase_sinc_kernel(sample_rate, target_sr)
    _, _, o_u, n_u = polyphase_sinc_kernel(target_sr, sample_rate)

    Td = -(-n_d * T // o_d)                  # resampled length (ceil)
    num_pkts = -(-Td // fs)
    L_dec = num_pkts * fs
    Tu = -(-n_u * L_dec // o_u)

    received = np.asarray(received)
    assert received.shape[0] == num_pkts, "received mask must have one entry per packet"
    src = jnp.asarray(plc_source_indices(received, loss_behavior))

    st_d, Md = _plan_stage(sample_rate, target_sr, L_dec)
    st_u, Mu = _plan_stage(target_sr, sample_rate, Tu)
    cfg = _Cfg(T=T, Td=Td, fs=fs, num_pkts=num_pkts, Tu=Tu, down=st_d, up=st_u)

    decoded = _opus_device(waveform[0], src, jnp.asarray(Md), jnp.asarray(Mu), cfg=cfg)
    return decoded, bps, plr, target_sr, received


# --------------------------------------------------------------------------
# Pure-numpy reference of the modeled pipeline (structural self-check)
# --------------------------------------------------------------------------
def _numpy_reference(x, received, sample_rate, target_sr, fs, T):
    kd, wd, od, nd = polyphase_sinc_kernel(sample_rate, target_sr)
    K_d = kd.shape[1]
    Td = math.ceil(nd * T / od)
    num_pkts = math.ceil(Td / fs)
    nb = math.ceil(Td / nd)
    xp = np.zeros(wd + T + nb * od + K_d, np.float32)
    xp[wd:wd + T] = x
    y = np.zeros(nb * nd, np.float32)
    for i in range(nb):
        y[i * nd:(i + 1) * nd] = kd @ xp[i * od: i * od + K_d]
    y = y[:Td]
    q = np.clip(y * 32767.0, -32768.0, 32767.0).astype(np.int32).astype(np.float32) / 32767.0
    L = num_pkts * fs
    pcm = np.zeros(L, np.float32)
    pcm[:Td] = q
    frames = pcm.reshape(num_pkts, fs)
    out_frames = np.zeros_like(frames)
    last = np.zeros(fs, np.float32)
    for f in range(num_pkts):
        if received[f]:
            last = frames[f]
            out_frames[f] = frames[f]
        else:
            out_frames[f] = last
    z = out_frames.reshape(-1)
    ku, wu, ou, nu = polyphase_sinc_kernel(target_sr, sample_rate)
    K_u = ku.shape[1]
    Tu = math.ceil(nu * L / ou)
    nbu = math.ceil(Tu / nu)
    zp = np.zeros(wu + L + nbu * ou + K_u, np.float32)
    zp[wu:wu + L] = z
    u = np.zeros(nbu * nu, np.float32)
    for i in range(nbu):
        u[i * nu:(i + 1) * nu] = ku @ zp[i * ou: i * ou + K_u]
    u = u[:Tu]
    u = np.pad(u, (0, T - Tu)) if Tu < T else u[:T]
    return u[None, :]


# --------------------------------------------------------------------------
if __name__ == "__main__":
    sample_rate = 16000
    frame_duration_ms = 20.0
    T = 1024
    bps = 9000      # -> target_sr = 8000
    plr = 0.1       # passed explicitly (>= 0), so no host RNG draw

    key = jax.random.PRNGKey(0)
    waveform = jax.random.uniform(key, (1, T), jnp.float32, minval=-0.9, maxval=0.9)

    # Derive the packet count the same way the module does, to build `received`.
    target_sr = 8000
    frame_samples = int(frame_duration_ms / 1000.0 * target_sr)   # 160
    Td = math.ceil(target_sr * T / sample_rate)                   # 512
    num_pkts = math.ceil(Td / frame_samples)                      # 4
    received = np.array(([1, 0, 0, 1] + [1] * num_pkts)[:num_pkts], dtype=np.int32)

    out, bps_o, plr_o, sr_o, recv_o = opus_augment_forward(
        waveform, received,
        sample_rate=sample_rate, frame_duration_ms=frame_duration_ms,
        bps=bps, plr=plr, loss_behavior="plc")
    out = jax.block_until_ready(out)

    assert out.shape == waveform.shape and out.dtype == jnp.float32
    assert bool(jnp.all(jnp.isfinite(out)))
    ref = _numpy_reference(np.asarray(waveform[0]), received, sample_rate,
                           target_sr, frame_samples, T)
    err = float(np.max(np.abs(np.asarray(out) - ref)))
    # Loose bound: this is a structural check (windowing / PLC / masking);
    # exactness is limited by the MXU f32 matmul path and int16 truncation
    # boundaries.
    assert err < 2e-2, f"mismatch vs numpy reference: {err}"
    assert sr_o == target_sr and bps_o == bps
    print("KERNEL_OK")
</pallas_src>

<mosaic_0001>
module attributes {stable_mosaic.version = 11 : i64} {
  func.func @_resample_canvas_kernel(%arg0: i32, %arg1: memref<8x144xf32, #tpu.memory_space<vmem>>, %arg2: memref<144x256xf32, #tpu.memory_space<vmem>>, %arg3: memref<8x256xf32, #tpu.memory_space<vmem>>) attributes {dimension_semantics = [#tpu.dimension_semantics<parallel>], iteration_bounds = array<i64: 1>, scalar_prefetch = 0 : i64, scratch_operands = 0 : i64, tpu.core_type = #tpu.core_type<tc>, window_params = [{transform_indices = @transform_0, window_bounds = array<i64: 8, 144>}, {pipeline_mode = #tpu.pipeline_mode<synchronous>, transform_indices = @transform_1, window_bounds = array<i64: 144, 256>}, {transform_indices = @transform_2, window_bounds = array<i64: 8, 256>}]} {
    %c0 = arith.constant 0 : index
    %c0_0 = arith.constant 0 : index
    %0 = vector.load %arg1[%c0, %c0_0] : memref<8x144xf32, #tpu.memory_space<vmem>>, vector<8x144xf32>
    %c0_1 = arith.constant 0 : index
    %c0_2 = arith.constant 0 : index
    %1 = vector.load %arg2[%c0_1, %c0_2] : memref<144x256xf32, #tpu.memory_space<vmem>>, vector<144x256xf32>
    %cst = arith.constant dense<0.000000e+00> : vector<8x256xf32>
    %2 = tpu.matmul %0, %1, %cst {dimension_numbers = #tpu.dot_dimension_numbers<[1], [0], [0], [1], [0, 0, 1, 1], [], []>} : vector<8x144xf32>, vector<144x256xf32>, vector<8x256xf32> -> vector<8x256xf32>
    %3 = tpu.iota {dimensions = array<i32: 0>} : vector<8x256xi32>
    %4 = tpu.iota {dimensions = array<i32: 1>} : vector<8x256xi32>
    %c8_i32 = arith.constant 8 : i32
    %5 = arith.muli %arg0, %c8_i32 : i32
    %6 = vector.broadcast %5 : i32 to vector<8x256xi32>
    %7 = arith.addi %6, %3 : vector<8x256xi32>
    %c256_i32 = arith.constant 256 : i32
    %8 = vector.broadcast %c256_i32 : i32 to vector<8x256xi32>
    %9 = arith.muli %7, %8 : vector<8x256xi32>
    %10 = arith.addi %9, %4 : vector<8x256xi32>
    %c1280_i32 = arith.constant 1280 : i32
    %11 = vector.broadcast %c1280_i32 : i32 to vector<8x256xi32>
    %12 = arith.cmpi slt, %10, %11 : vector<8x256xi32>
    %cst_3 = arith.constant 0.000000e+00 : f32
    %13 = vector.broadcast %cst_3 : f32 to vector<8x256xf32>
    %14 = arith.select %12, %2, %13 : vector<8x256xi1>, vector<8x256xf32>
    %c0_4 = arith.constant 0 : index
    %c0_5 = arith.constant 0 : index
    %15 = vector.load %arg3[%c0_4, %c0_5] : memref<8x256xf32, #tpu.memory_space<vmem>>, vector<8x256xf32>
    tpu.vector_store %arg3[%c0_4, %c0_5], %14 {strides = array<i32>} : memref<8x256xf32, #tpu.memory_space<vmem>>, vector<8x256xf32>,
    return
  }
  func.func @transform_0(%arg0: i32) -> (i32, i32) {
    %c0_i32 = arith.constant 0 : i32
    %c0_i32_0 = arith.constant 0 : i32
    return %arg0, %c0_i32 : i32, i32
  }
  func.func @transform_1(%arg0: i32) -> (i32, i32) {
    %c0_i32 = arith.constant 0 : i32
    %c0_i32_0 = arith.constant 0 : i32
    %c0_i32_1 = arith.constant 0 : i32
    return %c0_i32, %c0_i32_0 : i32, i32
  }
  func.func @transform_2(%arg0: i32) -> (i32, i32) {
    %c0_i32 = arith.constant 0 : i32
    %c0_i32_0 = arith.constant 0 : i32
    return %arg0, %c0_i32 : i32, i32
  }
}

module attributes {stable_mosaic.version = 11 : i64} {
  func.func @_resample_canvas_kernel(%arg0: i32, %arg1: memref<8x544xf32, #tpu.memory_space<vmem>>, %arg2: memref<544x256xf32, #tpu.memory_space<vmem>>, %arg3: memref<8x256xf32, #tpu.memory_space<vmem>>) attributes {dimension_semantics = [#tpu.dimension_semantics<parallel>], iteration_bounds = array<i64: 1>, scalar_prefetch = 0 : i64, scratch_operands = 0 : i64, tpu.core_type = #tpu.core_type<tc>, window_params = [{transform_indices = @transform_0, window_bounds = array<i64: 8, 544>}, {pipeline_mode = #tpu.pipeline_mode<synchronous>, transform_indices = @transform_1, window_bounds = array<i64: 544, 256>}, {transform_indices = @transform_2, window_bounds = array<i64: 8, 256>}]} {
    %c0 = arith.constant 0 : index
    %c0_0 = arith.constant 0 : index
    %0 = vector.load %arg1[%c0, %c0_0] : memref<8x544xf32, #tpu.memory_space<vmem>>, vector<8x544xf32>
    %c0_1 = arith.constant 0 : index
    %c0_2 = arith.constant 0 : index
    %1 = vector.load %arg2[%c0_1, %c0_2] : memref<544x256xf32, #tpu.memory_space<vmem>>, vector<544x256xf32>
    %cst = arith.constant dense<0.000000e+00> : vector<8x256xf32>
    %2 = tpu.matmul %0, %1, %cst {dimension_numbers = #tpu.dot_dimension_numbers<[1], [0], [0], [1], [0, 0, 1, 1], [], []>} : vector<8x544xf32>, vector<544x256xf32>, vector<8x256xf32> -> vector<8x256xf32>
    %cst_3 = arith.constant 3.276700e+04 : f32
    %3 = vector.broadcast %cst_3 : f32 to vector<8x256xf32>
    %4 = arith.mulf %2, %3 : vector<8x256xf32>
    %cst_4 = arith.constant -3.276800e+04 : f32
    %cst_5 = arith.constant 3.276700e+04 : f32
    %5 = vector.broadcast %cst_4 : f32 to vector<8x256xf32>
    %6 = arith.maximumf %5, %4 : vector<8x256xf32>
    %7 = vector.broadcast %cst_5 : f32 to vector<8x256xf32>
    %8 = arith.minimumf %7, %6 : vector<8x256xf32>
    %9 = arith.fptosi %8 : vector<8x256xf32> to vector<8x256xi32>
    %10 = arith.sitofp %9 : vector<8x256xi32> to vector<8x256xf32>
    %cst_6 = arith.constant 3.05185094E-5 : f32
    %11 = vector.broadcast %cst_6 : f32 to vector<8x256xf32>
    %12 = arith.mulf %10, %11 : vector<8x256xf32>
    %13 = tpu.iota {dimensions = array<i32: 0>} : vector<8x256xi32>
    %14 = tpu.iota {dimensions = array<i32: 1>} : vector<8x256xi32>
    %c8_i32 = arith.constant 8 : i32
    %15 = arith.muli %arg0, %c8_i32 : i32
    %16 = vector.broadcast %15 : i32 to vector<8x256xi32>
    %17 = arith.addi %16, %13 : vector<8x256xi32>
    %c256_i32 = arith.constant 256 : i32
    %18 = vector.broadcast %c256_i32 : i32 to vector<8x256xi32>
    %19 = arith.muli %17, %18 : vector<8x256xi32>
    %20 = arith.addi %19, %14 : vector<8x256xi32>
    %c512_i32 = arith.constant 512 : i32
    %21 = vector.broadcast %c512_i32 : i32 to vector<8x256xi32>
    %22 = arith.cmpi slt, %20, %21 : vector<8x256xi32>
    %cst_7 = arith.constant 0.000000e+00 : f32
    %23 = vector.broadcast %cst_7 : f32 to vector<8x256xf32>
    %24 = arith.select %22, %12, %23 : vector<8x256xi1>, vector<8x256xf32>
    %c0_8 = arith.constant 0 : index
    %c0_9 = arith.constant 0 : index
    %25 = vector.load %arg3[%c0_8, %c0_9] : memref<8x256xf32, #tpu.memory_space<vmem>>, vector<8x256xf32>
    tpu.vector_store %arg3[%c0_8, %c0_9], %24 {strides = array<i32>} : memref<8x256xf32, #tpu.memory_space<vmem>>, vector<8x256xf32>,
    return
  }
  func.func @transform_0(%arg0: i32) -> (i32, i32) {
    %c0_i32 = arith.constant 0 : i32
    %c0_i32_0 = arith.constant 0 : i32
    return %arg0, %c0_i32 : i32, i32
  }
  func.func @transform_1(%arg0: i32) -> (i32, i32) {
    %c0_i32 = arith.constant 0 : i32
    %c0_i32_0 = arith.constant 0 : i32
    %c0_i32_1 = arith.constant 0 : i32
    return %c0_i32, %c0_i32_0 : i32, i32
  }
  func.func @transform_2(%arg0: i32) -> (i32, i32) {
    %c0_i32 = arith.constant 0 : i32
    %c0_i32_0 = arith.constant 0 : i32
    return %arg0, %c0_i32 : i32, i32
  }
}

</mosaic_0001>

<bundles_post_ra>
// kernel: _opus_device.3
= control target key start
LH: loop header
LB: loop body
LE: loop exit
PB: predicated region body
PF: predicated region fallthrough
CT: control target
= control target key end

     0   :  { %vm49_vm0 = vcmask 130048   ;;  %v124_v56 = vlaneseq  ;;  %s317_s1 = inlined_call_operand.vmem [shape: f32[144,256], index: 1, kind: input, shape index: {}]   ;;  %s318_s0 = inlined_call_operand.vmem [shape: f32[8,144], index: 0, kind: input, shape index: {}]   ;;  %s319_s2 = inlined_call_operand.vmem [shape: f32[8,256], index: 2, kind: output, shape index: {}]  }
   0x1   :  { %v14_v0 = vld [vmem:[%s317_s1 + $0x8] sm:$0xff]  ;;  %v16_v1 = vld [vmem:[%s317_s1 + $0x18] sm:$0xff]  ;;  %v13_v2 = vld [vmem:[%s317_s1] sm:$0xff] }
   0x2   :  { %v146_v3 = vpack.c.bf16 %v16_v1, %v14_v0  ;;  %v15_v4 = vld [vmem:[%s317_s1 + $0x10] sm:$0xff]  ;;  %v18_v5 = vld [vmem:[%s317_s1 + $0x28] sm:$0xff]  ;;  %v20_v6 = vld [vmem:[%s317_s1 + $0x38] sm:$0xff]  ;;  %v125_v57 = vshrl.u32 %v124_v56, 7  ;;  %v127_v58 = vand.u32 127, %v124_v56 }
   0x3   :  { %v148_v7 = vpack.c.bf16 %v15_v4, %v13_v2  ;;  %v150_v8 = vpack.c.bf16 %v20_v6, %v18_v5  ;;  %v17_v9 = vld [vmem:[%s317_s1 + $0x20] sm:$0xff]  ;;  %v19_v10 = vld [vmem:[%s317_s1 + $0x30] sm:$0xff]  ;;  %v22_v11 = vld [vmem:[%s317_s1 + $0x48] sm:$0xff] }
   0x4   :  { %147 = vmatprep.subr.bf16.mxu0 %v146_v3  ;;  %v24_v12 = vld [vmem:[%s317_s1 + $0x58] sm:$0xff]  ;;  %v152_v13 = vpack.c.bf16 %v19_v10, %v17_v9  ;;  %v21_v15 = vld [vmem:[%s317_s1 + $0x40] sm:$0xff]  ;;  %v23_v16 = vld [vmem:[%s317_s1 + $0x50] sm:$0xff]  ;;  %v132_v59 = vmul.u32 256, %v125_v57  ;;  %v128_v60 = vadd.s32 128, %v127_v58 }
   0x5   :  { %149 = vmatpush1.bf16.msra.mxu0 %v148_v7  ;;  %v154_v14 = vpack.c.bf16 %v24_v12, %v22_v11  ;;  %v26_v17 = vld [vmem:[%s317_s1 + $0x68] sm:$0xff]  ;;  %v28_v18 = vld [vmem:[%s317_s1 + $0x78] sm:$0xff]  ;;  %v156_v19 = vpack.c.bf16 %v23_v16, %v21_v15  ;;  %v25_v21 = vld [vmem:[%s317_s1 + $0x60] sm:$0xff] }
   0x6   :  { %151 = vmatprep.subr.bf16.mxu0 %v150_v8  ;;  %v158_v20 = vpack.c.bf16 %v28_v18, %v26_v17  ;;  %v27_v22 = vld [vmem:[%s317_s1 + $0x70] sm:$0xff]  ;;  %v30_v23 = vld [vmem:[%s317_s1 + $0x88] sm:$0xff]  ;;  %v32_v24 = vld [vmem:[%s317_s1 + $0x98] sm:$0xff]  ;;  %v133_v61 = vadd.s32 %v132_v59, %v127_v58  ;;  %v134_v62 = vadd.s32 %v132_v59, %v128_v60 }
   0x7   :  { %v160_v25 = vpack.c.bf16 %v27_v22, %v25_v21  ;;  %v12_v26 = vld [vmem:[%s318_s0 + $0x8] sm:$0xff]  ;;  %v162_v27 = vpack.c.bf16 %v32_v24, %v30_v23  ;;  %v29_v28 = vld [vmem:[%s317_s1 + $0x80] sm:$0xff]  ;;  %v31_v29 = vld [vmem:[%s317_s1 + $0x90] sm:$0xff] }
   0x8   :  { %145 = vmatprep.mubr.msk.f32.mxu0 %vm49_vm0, %v12_v26  ;;  %v34_v30 = vld [vmem:[%s317_s1 + $0xa8] sm:$0xff]  ;;  %v36_v31 = vld [vmem:[%s317_s1 + $0xb8] sm:$0xff]  ;;  %v164_v32 = vpack.c.bf16 %v31_v29, %v29_v28  ;;  %v33_v34 = vld [vmem:[%s317_s1 + $0xa0] sm:$0xff]  ;;  %vm135_vm1 = vcmp.lt.s32.totalorder %v133_v61, 1280  ;;  %vm136_vm2 = vcmp.lt.s32.totalorder %v134_v62, 1280 }
   0x9   :  { %153 = vmatpush1.bf16.msra.mxu0 %v152_v13  ;;  %v166_v33 = vpack.c.bf16 %v36_v31, %v34_v30  ;;  %v35_v35 = vld [vmem:[%s317_s1 + $0xb0] sm:$0xff]  ;;  %v38_v36 = vld [vmem:[%s317_s1 + $0xc8] sm:$0xff]  ;;  %v40_v37 = vld [vmem:[%s317_s1 + $0xd8] sm:$0xff] }
   0xa   :  { %155 = vmatprep.subr.bf16.mxu0 %v154_v14  ;;  %v168_v38 = vpack.c.bf16 %v35_v35, %v33_v34  ;;  %v170_v39 = vpack.c.bf16 %v40_v37, %v38_v36  ;;  %v37_v40 = vld [vmem:[%s317_s1 + $0xc0] sm:$0xff]  ;;  %v39_v41 = vld [vmem:[%s317_s1 + $0xd0] sm:$0xff]  ;;  %v42_v42 = vld [vmem:[%s317_s1 + $0xe8] sm:$0xff] }
   0xb   :  { %v44_v43 = vld [vmem:[%s317_s1 + $0xf8] sm:$0xff]  ;;  %v172_v44 = vpack.c.bf16 %v39_v41, %v37_v40  ;;  %v41_v46 = vld [vmem:[%s317_s1 + $0xe0] sm:$0xff]  ;;  %v43_v47 = vld [vmem:[%s317_s1 + $0xf0] sm:$0xff] }
   0xc   :  { %v174_v45 = vpack.c.bf16 %v44_v43, %v42_v42  ;;  %v46_v48 = vld [vmem:[%s317_s1 + $0x108] sm:$0xff]  ;;  %v48_v49 = vld [vmem:[%s317_s1 + $0x118] sm:$0xff]  ;;  %v176_v50 = vpack.c.bf16 %v43_v47, %v41_v46  ;;  %v45_v52 = vld [vmem:[%s317_s1 + $0x100] sm:$0xff] }
   0xd   :  { %157 = vmatpush1.bf16.msra.mxu0 %v156_v19  ;;  %v178_v51 = vpack.c.bf16 %v48_v49, %v46_v48  ;;  %v47_v53 = vld [vmem:[%s317_s1 + $0x110] sm:$0xff]  ;;  %v11_v55 = vld [vmem:[%s318_s0] sm:$0xff] }
   0xe   :  { %159 = vmatprep.subr.bf16.mxu0 %v158_v20  ;;  %v180_v54 = vpack.c.bf16 %v47_v53, %v45_v52 }
  0x11   :  { %161 = vmatpush1.bf16.msra.mxu0 %v160_v25 }
  0x12   :  { %163 = vmatprep.subr.bf16.mxu0 %v162_v27 }
  0x15   :  { %165 = vmatpush1.bf16.msra.mxu0 %v164_v32 }
  0x16   :  { %167 = vmatprep.subr.bf16.mxu0 %v166_v33 }
  0x19   :  { %169 = vmatpush1.bf16.msra.mxu0 %v168_v38 }
  0x1a   :  { %171 = vmatprep.subr.bf16.mxu0 %v170_v39 }
  0x1d   :  { %173 = vmatpush1.bf16.msra.mxu0 %v172_v44 }
  0x1e   :  { %175 = vmatprep.subr.bf16.mxu0 %v174_v45 }
  0x21   :  { %177 = vmatpush1.bf16.msra.mxu0 %v176_v50 }
  0x22   :  { %179 = vmatprep.subr.bf16.mxu0 %v178_v51 }
  0x25   :  { %181 = vmatpush1.bf16.msra.mxu0 %v180_v54 }
  0x28   :  { %118 = vmatmul.mubr.f32.vlgmr.msra.gmra.mrb[0].mxu0 %v11_v55 }
  0xfb   :  { %v119_v63 = vpop.f32.mrb[0].mxu0 }
  0xfc   :  { %v137_v0 = vsel %vm135_vm1, %v119_v63, 0.0  ;;  %v121_v1 = vpop.f32.mrb[1].mxu0 }
  0xfd   :  { %139 = vst [vmem:[%s319_s2] sm:$0xff] %v137_v0  ;;  %v138_v2 = vsel %vm136_vm2, %v121_v1, 0.0 }
  0xfe   :  { %140 = vst [vmem:[%s319_s2 + $0x8] sm:$0xff] %v138_v2 }

// kernel: _opus_device.2
= control target key start
LH: loop header
LB: loop body
LE: loop exit
PB: predicated region body
PF: predicated region fallthrough
CT: control target
= control target key end

     0   :  { %7 = vsyncpa [#allocation3], 0  ;;  %s590_s9 = smov [#allocation2]   ;;  %s642_s0 = inlined_call_operand.vmem [shape: f32[8,544], index: 0, kind: input, shape index: {}]   ;;  %s643_s1 = inlined_call_operand.hbm [shape: f32[544,256], index: 1, kind: input, shape index: {}]   ;;  %s644_s2 = inlined_call_operand.vmem [shape: f32[8,256], index: 2, kind: output, shape index: {}]  }
   0x1   :  { %s15_s10 = sshll.u32 %s590_s9, 4  ;;  %s566_s13 = scalar_lea.hbm %s643_s1, 17408  ;;  %s16_s10 = int_to_ptr.vmem [resolvable:$true] %s15_s10 }
   0x2   :  { %p567_p0 = scmp.ne.s32.totalorder %s643_s1, %s566_s13  ;;  %p570_p1 = scmp.lt.u32.totalorder %s566_s13, %s643_s1 }
   0x4   :  { %p572_p2 = pnand %p570_p1, %p567_p0 }
   0x6   :  { %575 = shalt.err (!%p572_p2)
}
   0x7   :  { %s576_s18 = scalar_lea.vmem %s16_s10, 17408  ;;  %p581_p4 = scmp.lt.s32.totalorder %s16_s10, %s16_s10 }
   0x8   :  { %p577_p3 = scmp.ne.s32.totalorder %s16_s10, %s576_s18  ;;  %p582_p5 = scmp.lt.s32.totalorder %s576_s18, %s576_s18 }
   0xa   :  { %p583_p6 = por %p582_p5, %p581_p4 }
   0xc   :  { %p584_p7 = pnand %p583_p6, %p577_p3 }
   0xe   :  { %587 = shalt.err (!%p584_p7)
}
   0xf   :  { %s591_s19 = smov 256   ;;  %s592_s20 = smov 16  }
  0x10   :  { %21 = dma.hbm_to_vmem [thread:$0]  %s643_s1, 17408, %s16_s10, [#allocation3], %s591_s19, %s591_s19, %s592_s20  }
  0x11   :  { %588 = dma.done.wait [#allocation3], 17408  }
  0x12   :  { %589 = vsyncadd [#allocation3], 4294949888  ;;  %v95_v0 = vld [vmem:[#allocation2 + $0x208] sm:$0xff]  ;;  %v97_v1 = vld [vmem:[#allocation2 + $0x218] sm:$0xff]  ;;  %vm166_vm0 = vcmask 261120  }
  0x13   :  { %v94_v2 = vld [vmem:[#allocation2 + $0x200] sm:$0xff]  ;;  %v482_v3 = vpack.c.bf16 %v97_v1, %v95_v0  ;;  %v96_v4 = vld [vmem:[#allocation2 + $0x210] sm:$0xff]  ;;  %v99_v5 = vld [vmem:[#allocation2 + $0x228] sm:$0xff] }
  0x14   :  { %v101_v6 = vld [vmem:[#allocation2 + $0x238] sm:$0xff]  ;;  %v484_v7 = vpack.c.bf16 %v96_v4, %v94_v2  ;;  %v98_v9 = vld [vmem:[#allocation2 + $0x220] sm:$0xff]  ;;  %v100_v10 = vld [vmem:[#allocation2 + $0x230] sm:$0xff] }
  0x15   :  { %v486_v8 = vpack.c.bf16 %v101_v6, %v99_v5  ;;  %v31_v11 = vld [vmem:[#allocation2 + $0x8] sm:$0xff]  ;;  %483 = vmatprep.subr.bf16.mxu0 %v482_v3  ;;  %v33_v12 = vld [vmem:[#allocation2 + $0x18] sm:$0xff]  ;;  %v488_v15 = vpack.c.bf16 %v100_v10, %v98_v9  ;;  %v30_v17 = vld [vmem:[#allocation2] sm:$0xff] }
  0x16   :  { %v103_v13 = vld [vmem:[#allocation2 + $0x248] sm:$0xff]  ;;  %v105_v14 = vld [vmem:[#allocation2 + $0x258] sm:$0xff]  ;;  %485 = vmatpush1.bf16.msra.mxu0 %v484_v7  ;;  %v418_v16 = vpack.c.bf16 %v33_v12, %v31_v11  ;;  %v32_v18 = vld [vmem:[#allocation2 + $0x10] sm:$0xff] }
  0x17   :  { %v102_v19 = vld [vmem:[#allocation2 + $0x240] sm:$0xff]  ;;  %487 = vmatprep.subr.bf16.mxu0 %v486_v8  ;;  %v490_v20 = vpack.c.bf16 %v105_v14, %v103_v13  ;;  %v420_v21 = vpack.c.bf16 %v32_v18, %v30_v17  ;;  %v104_v22 = vld [vmem:[#allocation2 + $0x250] sm:$0xff]  ;;  %v35_v23 = vld [vmem:[#allocation2 + $0x28] sm:$0xff] }
  0x18   :  { %v37_v24 = vld [vmem:[#allocation2 + $0x38] sm:$0xff]  ;;  %419 = vmatprep.subr.bf16.mxu1 %v418_v16  ;;  %v107_v26 = vld [vmem:[#allocation2 + $0x268] sm:$0xff]  ;;  %v34_v28 = vld [vmem:[#allocation2 + $0x20] sm:$0xff]  ;;  %v492_v30 = vpack.c.bf16 %v104_v22, %v102_v19 }
  0x19   :  { %v422_v25 = vpack.c.bf16 %v37_v24, %v35_v23  ;;  %v109_v27 = vld [vmem:[#allocation2 + $0x278] sm:$0xff]  ;;  %421 = vmatpush1.bf16.msra.mxu1 %v420_v21  ;;  %v36_v29 = vld [vmem:[#allocation2 + $0x30] sm:$0xff]  ;;  %v106_v32 = vld [vmem:[#allocation2 + $0x260] sm:$0xff] }
  0x1a   :  { %489 = vmatpush1.bf16.msra.mxu0 %v488_v15  ;;  %v424_v31 = vpack.c.bf16 %v36_v29, %v34_v28  ;;  %v39_v33 = vld [vmem:[#allocation2 + $0x48] sm:$0xff]  ;;  %v41_v34 = vld [vmem:[#allocation2 + $0x58] sm:$0xff]  ;;  %v494_v35 = vpack.c.bf16 %v109_v27, %v107_v26  ;;  %v108_v36 = vld [vmem:[#allocation2 + $0x270] sm:$0xff] }
  0x1b   :  { %423 = vmatprep.subr.bf16.mxu1 %v422_v25  ;;  %491 = vmatprep.subr.bf16.mxu0 %v490_v20  ;;  %v426_v37 = vpack.c.bf16 %v41_v34, %v39_v33  ;;  %v38_v38 = vld [vmem:[#allocation2 + $0x40] sm:$0xff]  ;;  %v40_v39 = vld [vmem:[#allocation2 + $0x50] sm:$0xff]  ;;  %v111_v40 = vld [vmem:[#allocation2 + $0x288] sm:$0xff]  ;;  %v496_v45 = vpack.c.bf16 %v108_v36, %v106_v32 }
  0x1c   :  { %v113_v41 = vld [vmem:[#allocation2 + $0x298] sm:$0xff]  ;;  %v43_v42 = vld [vmem:[#allocation2 + $0x68] sm:$0xff]  ;;  %v428_v43 = vpack.c.bf16 %v40_v39, %v38_v38  ;;  %v110_v46 = vld [vmem:[#allocation2 + $0x280] sm:$0xff] }
  0x1d   :  { %425 = vmatpush1.bf16.msra.mxu1 %v424_v31  ;;  %v45_v44 = vld [vmem:[#allocation2 + $0x78] sm:$0xff]  ;;  %v42_v48 = vld [vmem:[#allocation2 + $0x60] sm:$0xff]  ;;  %v44_v49 = vld [vmem:[#allocation2 + $0x70] sm:$0xff]  ;;  %v498_v50 = vpack.c.bf16 %v113_v41, %v111_v40 }
  0x1e   :  { %493 = vmatpush1.bf16.msra.mxu0 %v492_v30  ;;  %427 = vmatprep.subr.bf16.mxu1 %v426_v37  ;;  %v430_v47 = vpack.c.bf16 %v45_v44, %v43_v42  ;;  %v112_v51 = vld [vmem:[#allocation2 + $0x290] sm:$0xff]  ;;  %v47_v52 = vld [vmem:[#allocation2 + $0x88] sm:$0xff]  ;;  %v49_v53 = vld [vmem:[#allocation2 + $0x98] sm:$0xff]  ;;  %v432_v56 = vpack.c.bf16 %v44_v49, %v42_v48 }
  0x1f   :  { %495 = vmatprep.subr.bf16.mxu0 %v494_v35  ;;  %v115_v54 = vld [vmem:[#allocation2 + $0x2a8] sm:$0xff]  ;;  %v117_v55 = vld [vmem:[#allocation2 + $0x2b8] sm:$0xff]  ;;  %v500_v57 = vpack.c.bf16 %v112_v51, %v110_v46  ;;  %v114_v58 = vld [vmem:[#allocation2 + $0x2a0] sm:$0xff]  ;;  %v434_v59 = vpack.c.bf16 %v49_v53, %v47_v52 }
  0x20   :  { %v46_v60 = vld [vmem:[#allocation2 + $0x80] sm:$0xff]  ;;  %v48_v61 = vld [vmem:[#allocation2 + $0x90] sm:$0xff]  ;;  %v502_v62 = vpack.c.bf16 %v117_v55, %v115_v54  ;;  %v51_v0 = vld [vmem:[#allocation2 + $0xa8] sm:$0xff] }
  0x21   :  { %429 = vmatpush1.bf16.msra.mxu1 %v428_v43  ;;  %v116_v63 = vld [vmem:[#allocation2 + $0x2b0] sm:$0xff]  ;;  %v53_v1 = vld [vmem:[#allocation2 + $0xb8] sm:$0xff]  ;;  %v119_v2 = vld [vmem:[#allocation2 + $0x2c8] sm:$0xff]  ;;  %v436_v4 = vpack.c.bf16 %v48_v61, %v46_v60 }
  0x22   :  { %497 = vmatpush1.bf16.msra.mxu0 %v496_v45  ;;  %431 = vmatprep.subr.bf16.mxu1 %v430_v47  ;;  %v121_v3 = vld [vmem:[#allocation2 + $0x2d8] sm:$0xff]  ;;  %v504_v5 = vpack.c.bf16 %v116_v63, %v114_v58  ;;  %v118_v6 = vld [vmem:[#allocation2 + $0x2c0] sm:$0xff]  ;;  %v438_v7 = vpack.c.bf16 %v53_v1, %v51_v0  ;;  %v52_v9 = vld [vmem:[#allocation2 + $0xb0] sm:$0xff] }
  0x23   :  { %499 = vmatprep.subr.bf16.mxu0 %v498_v50  ;;  %v50_v8 = vld [vmem:[#allocation2 + $0xa0] sm:$0xff]  ;;  %v506_v10 = vpack.c.bf16 %v121_v3, %v119_v2  ;;  %v120_v11 = vld [vmem:[#allocation2 + $0x2d0] sm:$0xff]  ;;  %v55_v12 = vld [vmem:[#allocation2 + $0xc8] sm:$0xff] }
  0x24   :  { %v57_v13 = vld [vmem:[#allocation2 + $0xd8] sm:$0xff]  ;;  %v123_v14 = vld [vmem:[#allocation2 + $0x2e8] sm:$0xff]  ;;  %v440_v16 = vpack.c.bf16 %v52_v9, %v50_v8  ;;  %v508_v17 = vpack.c.bf16 %v120_v11, %v118_v6  ;;  %v122_v18 = vld [vmem:[#allocation2 + $0x2e0] sm:$0xff] }
  0x25   :  { %433 = vmatpush1.bf16.msra.mxu1 %v432_v56  ;;  %v125_v15 = vld [vmem:[#allocation2 + $0x2f8] sm:$0xff]  ;;  %v442_v19 = vpack.c.bf16 %v57_v13, %v55_v12  ;;  %v54_v20 = vld [vmem:[#allocation2 + $0xc0] sm:$0xff]  ;;  %v56_v21 = vld [vmem:[#allocation2 + $0xd0] sm:$0xff] }
  0x26   :  { %501 = vmatpush1.bf16.msra.mxu0 %v500_v57  ;;  %435 = vmatprep.subr.bf16.mxu1 %v434_v59  ;;  %v510_v22 = vpack.c.bf16 %v125_v15, %v123_v14  ;;  %v124_v23 = vld [vmem:[#allocation2 + $0x2f0] sm:$0xff]  ;;  %v59_v24 = vld [vmem:[#allocation2 + $0xe8] sm:$0xff]  ;;  %v61_v25 = vld [vmem:[#allocation2 + $0xf8] sm:$0xff]  ;;  %v444_v28 = vpack.c.bf16 %v56_v21, %v54_v20 }
  0x27   :  { %503 = vmatprep.subr.bf16.mxu0 %v502_v62  ;;  %v127_v26 = vld [vmem:[#allocation2 + $0x308] sm:$0xff]  ;;  %v129_v27 = vld [vmem:[#allocation2 + $0x318] sm:$0xff]  ;;  %v512_v29 = vpack.c.bf16 %v124_v23, %v122_v18  ;;  %v126_v30 = vld [vmem:[#allocation2 + $0x300] sm:$0xff]  ;;  %v446_v31 = vpack.c.bf16 %v61_v25, %v59_v24 }
  0x28   :  { %v58_v32 = vld [vmem:[#allocation2 + $0xe0] sm:$0xff]  ;;  %v60_v33 = vld [vmem:[#allocation2 + $0xf0] sm:$0xff]  ;;  %v514_v34 = vpack.c.bf16 %v129_v27, %v127_v26  ;;  %v63_v36 = vld [vmem:[#allocation2 + $0x108] sm:$0xff] }
  0x29   :  { %437 = vmatpush1.bf16.msra.mxu1 %v436_v4  ;;  %v128_v35 = vld [vmem:[#allocation2 + $0x310] sm:$0xff]  ;;  %v65_v37 = vld [vmem:[#allocation2 + $0x118] sm:$0xff]  ;;  %v131_v38 = vld [vmem:[#allocation2 + $0x328] sm:$0xff]  ;;  %v448_v40 = vpack.c.bf16 %v60_v33, %v58_v32 }
  0x2a   :  { %505 = vmatpush1.bf16.msra.mxu0 %v504_v5  ;;  %439 = vmatprep.subr.bf16.mxu1 %v438_v7  ;;  %v133_v39 = vld [vmem:[#allocation2 + $0x338] sm:$0xff]  ;;  %v516_v41 = vpack.c.bf16 %v128_v35, %v126_v30  ;;  %v130_v42 = vld [vmem:[#allocation2 + $0x320] sm:$0xff]  ;;  %v450_v43 = vpack.c.bf16 %v65_v37, %v63_v36  ;;  %v64_v45 = vld [vmem:[#allocation2 + $0x110] sm:$0xff] }
  0x2b   :  { %507 = vmatprep.subr.bf16.mxu0 %v506_v10  ;;  %v62_v44 = vld [vmem:[#allocation2 + $0x100] sm:$0xff]  ;;  %v518_v46 = vpack.c.bf16 %v133_v39, %v131_v38  ;;  %v132_v47 = vld [vmem:[#allocation2 + $0x330] sm:$0xff]  ;;  %v67_v48 = vld [vmem:[#allocation2 + $0x128] sm:$0xff] }
  0x2c   :  { %v69_v49 = vld [vmem:[#allocation2 + $0x138] sm:$0xff]  ;;  %v135_v50 = vld [vmem:[#allocation2 + $0x348] sm:$0xff]  ;;  %v452_v52 = vpack.c.bf16 %v64_v45, %v62_v44  ;;  %v520_v53 = vpack.c.bf16 %v132_v47, %v130_v42  ;;  %v134_v54 = vld [vmem:[#allocation2 + $0x340] sm:$0xff] }
  0x2d   :  { %441 = vmatpush1.bf16.msra.mxu1 %v440_v16  ;;  %v137_v51 = vld [vmem:[#allocation2 + $0x358] sm:$0xff]  ;;  %v454_v55 = vpack.c.bf16 %v69_v49, %v67_v48  ;;  %v66_v56 = vld [vmem:[#allocation2 + $0x120] sm:$0xff]  ;;  %v68_v57 = vld [vmem:[#allocation2 + $0x130] sm:$0xff] }
  0x2e   :  { %509 = vmatpush1.bf16.msra.mxu0 %v508_v17  ;;  %443 = vmatprep.subr.bf16.mxu1 %v442_v19  ;;  %v522_v58 = vpack.c.bf16 %v137_v51, %v135_v50  ;;  %v136_v59 = vld [vmem:[#allocation2 + $0x350] sm:$0xff]  ;;  %v71_v60 = vld [vmem:[#allocation2 + $0x148] sm:$0xff]  ;;  %v73_v61 = vld [vmem:[#allocation2 + $0x158] sm:$0xff]  ;;  %v456_v0 = vpack.c.bf16 %v68_v57, %v66_v56 }
  0x2f   :  { %511 = vmatprep.subr.bf16.mxu0 %v510_v22  ;;  %v139_v62 = vld [vmem:[#allocation2 + $0x368] sm:$0xff]  ;;  %v141_v63 = vld [vmem:[#allocation2 + $0x378] sm:$0xff]  ;;  %v138_v1 = vld [vmem:[#allocation2 + $0x360] sm:$0xff]  ;;  %v524_v2 = vpack.c.bf16 %v136_v59, %v134_v54  ;;  %v458_v3 = vpack.c.bf16 %v73_v61, %v71_v60 }
  0x30   :  { %v70_v4 = vld [vmem:[#allocation2 + $0x140] sm:$0xff]  ;;  %v72_v5 = vld [vmem:[#allocation2 + $0x150] sm:$0xff]  ;;  %v28_v6 = vld [vmem:[%s642_s0 + $0x18] sm:$0xff]  ;;  %v526_v7 = vpack.c.bf16 %v141_v63, %v139_v62 }
  0x31   :  { %445 = vmatpush1.bf16.msra.mxu1 %v444_v28  ;;  %v140_v8 = vld [vmem:[#allocation2 + $0x370] sm:$0xff]  ;;  %v75_v9 = vld [vmem:[#allocation2 + $0x168] sm:$0xff]  ;;  %v77_v10 = vld [vmem:[#allocation2 + $0x178] sm:$0xff]  ;;  %305 = vmatprep.mubr.f32.mxu0 %v28_v6  ;;  %v460_v13 = vpack.c.bf16 %v72_v5, %v70_v4 }
  0x32   :  { %513 = vmatpush1.bf16.msra.mxu0 %v512_v29  ;;  %447 = vmatprep.subr.bf16.mxu1 %v446_v31  ;;  %v143_v11 = vld [vmem:[#allocation2 + $0x388] sm:$0xff]  ;;  %v145_v12 = vld [vmem:[#allocation2 + $0x398] sm:$0xff]  ;;  %v528_v14 = vpack.c.bf16 %v140_v8, %v138_v1  ;;  %v142_v15 = vld [vmem:[#allocation2 + $0x380] sm:$0xff]  ;;  %v462_v16 = vpack.c.bf16 %v77_v10, %v75_v9 }
  0x33   :  { %515 = vmatprep.subr.bf16.mxu0 %v514_v34  ;;  %v74_v17 = vld [vmem:[#allocation2 + $0x160] sm:$0xff]  ;;  %v76_v18 = vld [vmem:[#allocation2 + $0x170] sm:$0xff]  ;;  %v530_v19 = vpack.c.bf16 %v145_v12, %v143_v11  ;;  %v79_v21 = vld [vmem:[#allocation2 + $0x188] sm:$0xff] }
  0x34   :  { %v144_v20 = vld [vmem:[#allocation2 + $0x390] sm:$0xff]  ;;  %v81_v22 = vld [vmem:[#allocation2 + $0x198] sm:$0xff]  ;;  %v147_v23 = vld [vmem:[#allocation2 + $0x3a8] sm:$0xff]  ;;  %v464_v26 = vpack.c.bf16 %v76_v18, %v74_v17 }
  0x35   :  { %449 = vmatpush1.bf16.msra.mxu1 %v448_v40  ;;  %v149_v24 = vld [vmem:[#allocation2 + $0x3b8] sm:$0xff]  ;;  %v26_v25 = vld [vmem:[%s642_s0 + $0x8] sm:$0xff]  ;;  %v532_v27 = vpack.c.bf16 %v144_v20, %v142_v15  ;;  %v146_v28 = vld [vmem:[#allocation2 + $0x3a0] sm:$0xff]  ;;  %v466_v29 = vpack.c.bf16 %v81_v22, %v79_v21  ;;  %v395_v20 = vlaneseq }
  0x36   :  { %517 = vmatpush1.bf16.msra.mxu0 %v516_v41  ;;  %451 = vmatprep.subr.bf16.mxu1 %v450_v43  ;;  %v78_v30 = vld [vmem:[#allocation2 + $0x180] sm:$0xff]  ;;  %v80_v31 = vld [vmem:[#allocation2 + $0x190] sm:$0xff]  ;;  %v534_v32 = vpack.c.bf16 %v149_v24, %v147_v23  ;;  %v83_v34 = vld [vmem:[#allocation2 + $0x1a8] sm:$0xff] }
  0x37   :  { %519 = vmatprep.subr.bf16.mxu0 %v518_v46  ;;  %234 = vmatprep.mubr.f32.mxu1 %v26_v25  ;;  %v148_v33 = vld [vmem:[#allocation2 + $0x3b0] sm:$0xff]  ;;  %v85_v35 = vld [vmem:[#allocation2 + $0x1b8] sm:$0xff]  ;;  %v151_v36 = vld [vmem:[#allocation2 + $0x3c8] sm:$0xff]  ;;  %v468_v38 = vpack.c.bf16 %v80_v31, %v78_v30  ;;  %v396_v24 = vshrl.u32 %v395_v20, 7 }
  0x38   :  { %v153_v37 = vld [vmem:[#allocation2 + $0x3d8] sm:$0xff]  ;;  %v536_v39 = vpack.c.bf16 %v148_v33, %v146_v28  ;;  %v150_v40 = vld [vmem:[#allocation2 + $0x3c0] sm:$0xff]  ;;  %v470_v41 = vpack.c.bf16 %v85_v35, %v83_v34  ;;  %v84_v43 = vld [vmem:[#allocation2 + $0x1b0] sm:$0xff] }
  0x39   :  { %453 = vmatpush1.bf16.msra.mxu1 %v452_v52  ;;  %v82_v42 = vld [vmem:[#allocation2 + $0x1a0] sm:$0xff]  ;;  %v538_v44 = vpack.c.bf16 %v153_v37, %v151_v36  ;;  %v152_v45 = vld [vmem:[#allocation2 + $0x3d0] sm:$0xff]  ;;  %v87_v46 = vld [vmem:[#allocation2 + $0x1c8] sm:$0xff]  ;;  %v403_v30 = vmul.u32 256, %v396_v24 }
  0x3a   :  { %521 = vmatpush1.bf16.msra.mxu0 %v520_v53  ;;  %455 = vmatprep.subr.bf16.mxu1 %v454_v55  ;;  %v89_v47 = vld [vmem:[#allocation2 + $0x1d8] sm:$0xff]  ;;  %v155_v48 = vld [vmem:[#allocation2 + $0x3e8] sm:$0xff]  ;;  %v472_v50 = vpack.c.bf16 %v84_v43, %v82_v42  ;;  %v540_v51 = vpack.c.bf16 %v152_v45, %v150_v40  ;;  %v154_v52 = vld [vmem:[#allocation2 + $0x3e0] sm:$0xff] }
  0x3b   :  { %523 = vmatprep.subr.bf16.mxu0 %v522_v58  ;;  %v157_v49 = vld [vmem:[#allocation2 + $0x3f8] sm:$0xff]  ;;  %v474_v53 = vpack.c.bf16 %v89_v47, %v87_v46  ;;  %v86_v54 = vld [vmem:[#allocation2 + $0x1c0] sm:$0xff]  ;;  %v88_v55 = vld [vmem:[#allocation2 + $0x1d0] sm:$0xff] }
  0x3c   :  { %v542_v56 = vpack.c.bf16 %v157_v49, %v155_v48  ;;  %v156_v57 = vld [vmem:[#allocation2 + $0x3f0] sm:$0xff]  ;;  %v91_v58 = vld [vmem:[#allocation2 + $0x1e8] sm:$0xff]  ;;  %v93_v59 = vld [vmem:[#allocation2 + $0x1f8] sm:$0xff]  ;;  %v476_v62 = vpack.c.bf16 %v88_v55, %v86_v54 }
  0x3d   :  { %457 = vmatpush1.bf16.msra.mxu1 %v456_v0  ;;  %v159_v60 = vld [vmem:[#allocation2 + $0x408] sm:$0xff]  ;;  %v161_v61 = vld [vmem:[#allocation2 + $0x418] sm:$0xff]  ;;  %v544_v63 = vpack.c.bf16 %v156_v57, %v154_v52  ;;  %v478_v0 = vpack.c.bf16 %v93_v59, %v91_v58  ;;  %v90_v1 = vld [vmem:[#allocation2 + $0x1e0] sm:$0xff] }
  0x3e   :  { %525 = vmatpush1.bf16.msra.mxu0 %v524_v2  ;;  %459 = vmatprep.subr.bf16.mxu1 %v458_v3  ;;  %v92_v2 = vld [vmem:[#allocation2 + $0x1f0] sm:$0xff]  ;;  %v546_v3 = vpack.c.bf16 %v161_v61, %v159_v60  ;;  %v158_v4 = vld [vmem:[#allocation2 + $0x400] sm:$0xff]  ;;  %v163_v6 = vld [vmem:[#allocation2 + $0x428] sm:$0xff] }
  0x3f   :  { %527 = vmatprep.subr.bf16.mxu0 %v526_v7  ;;  %v160_v5 = vld [vmem:[#allocation2 + $0x410] sm:$0xff]  ;;  %v165_v7 = vld [vmem:[#allocation2 + $0x438] sm:$0xff]  ;;  %v480_v8 = vpack.c.bf16 %v92_v2, %v90_v1  ;;  %v162_v12 = vld [vmem:[#allocation2 + $0x420] sm:$0xff] }
  0x40   :  { %v27_v9 = vld [vmem:[%s642_s0 + $0x10] sm:$0xff]  ;;  %v548_v10 = vpack.c.bf16 %v160_v5, %v158_v4  ;;  %v550_v11 = vpack.c.bf16 %v165_v7, %v163_v6  ;;  %v29_v17 = vld [vmem:[%s642_s0 + $0x20] sm:$0xff] }
  0x41   :  { %461 = vmatpush1.bf16.msra.mxu1 %v460_v13  ;;  %v164_v13 = vld [vmem:[#allocation2 + $0x430] sm:$0xff] }
  0x42   :  { %529 = vmatpush1.bf16.msra.mxu0 %v528_v14  ;;  %463 = vmatprep.subr.bf16.mxu1 %v462_v16  ;;  %v25_v14 = vld [vmem:[%s642_s0] sm:$0xff]  ;;  %v552_v15 = vpack.c.bf16 %v164_v13, %v162_v12  ;;  %v593_v16 = vmov 0.0  }
  0x43   :  { %531 = vmatprep.subr.bf16.mxu0 %v530_v19 }
  0x45   :  { %465 = vmatpush1.bf16.msra.mxu1 %v464_v26 }
  0x46   :  { %533 = vmatpush1.bf16.msra.mxu0 %v532_v27  ;;  %467 = vmatprep.subr.bf16.mxu1 %v466_v29  ;;  %v398_v27 = vand.u32 127, %v395_v20 }
  0x47   :  { %535 = vmatprep.subr.bf16.mxu0 %v534_v32 }
  0x48   :  { %v399_v33 = vadd.s32 128, %v398_v27  ;;  %v404_v36 = vadd.s32 %v403_v30, %v398_v27 }
  0x49   :  { %469 = vmatpush1.bf16.msra.mxu1 %v468_v38 }
  0x4a   :  { %537 = vmatpush1.bf16.msra.mxu0 %v536_v39  ;;  %471 = vmatprep.subr.bf16.mxu1 %v470_v41  ;;  %v405_v39 = vadd.s32 %v403_v30, %v399_v33  ;;  %vm406_vm1 = vcmp.lt.s32.totalorder %v404_v36, 512 }
  0x4b   :  { %539 = vmatprep.subr.bf16.mxu0 %v538_v44 }
  0x4c   :  { %vm407_vm2 = vcmp.lt.s32.totalorder %v405_v39, 512 }
  0x4d   :  { %473 = vmatpush1.bf16.msra.mxu1 %v472_v50 }
  0x4e   :  { %541 = vmatpush1.bf16.msra.mxu0 %v540_v51  ;;  %475 = vmatprep.subr.bf16.mxu1 %v474_v53 }
  0x4f   :  { %543 = vmatprep.subr.bf16.mxu0 %v542_v56 }
  0x51   :  { %477 = vmatpush1.bf16.msra.mxu1 %v476_v62 }
  0x52   :  { %545 = vmatpush1.bf16.msra.mxu0 %v544_v63  ;;  %479 = vmatprep.subr.bf16.mxu1 %v478_v0 }
  0x53   :  { %547 = vmatprep.subr.bf16.mxu0 %v546_v3 }
  0x55   :  { %306 = vmatmul.mubr.f32.vlgmr.msra.gmra.mrb[0].mxu0 %v27_v9  ;;  %481 = vmatpush1.bf16.msra.mxu1 %v480_v8 }
  0x56   :  { %549 = vmatpush1.bf16.msra.mxu0 %v548_v10  ;;  %376 = vmatprep.mubr.f32.mxu0 %v593_v16 }
  0x57   :  { %551 = vmatprep.subr.bf16.mxu0 %v550_v11 }
  0x58   :  { %235 = vmatmul.mubr.f32.vlgmr.msra.gmra.mrb[0].mxu1 %v25_v14 }
  0x5a   :  { %553 = vmatpush1.bf16.msra.mxu0 %v552_v15 }
  0x5d   :  { %417 = vmatmul.mubr.msk.f32.vlgmr.msra.gmra.mrb[0].mxu0 %vm166_vm0, %v29_v17 }
 0x12b   :  { %v236_v18 = vpop.f32.mrb[0].mxu1 }
 0x12c   :  { %v238_v19 = vpop.f32.mrb[1].mxu1 }
 0x130   :  { %v378_v21 = vpop.f32.mrb[0].mxu0 }
 0x131   :  { %v554_v22 = vadd.f32 %v378_v21, %v236_v18  ;;  %v380_v23 = vpop.f32.mrb[1].mxu0 }
 0x132   :  { %v555_v25 = vadd.f32 %v380_v23, %v238_v19 }
 0x133   :  { %v383_v26 = vmul.f32 32767.0, %v554_v22 }
 0x134   :  { %v384_v28 = vmul.f32 32767.0, %v555_v25 }
 0x135   :  { %v385_v29 = vmax.f32 %v383_v26, -32768.0 }
 0x136   :  { %v386_v31 = vmax.f32 %v384_v28, -32768.0 }
 0x137   :  { %v387_v32 = vmin.f32 %v385_v29, 32767.0 }
 0x138   :  { %v388_v34 = vmin.f32 %v386_v31, 32767.0 }
 0x139   :  { %v558_v35 = vtrunc.f32 %v387_v32 }
 0x13a   :  { %v560_v37 = vtrunc.f32 %v388_v34 }
 0x13b   :  { %v559_v38 = vcvt.f32.s32 %v558_v35 }
 0x13c   :  { %v561_v40 = vcvt.f32.s32 %v560_v37 }
 0x13d   :  { %v391_v41 = vcvt.s32.f32 %v559_v38 }
 0x13e   :  { %v392_v42 = vcvt.s32.f32 %v561_v40 }
 0x13f   :  { %v393_v43 = vmul.f32 3.051851e-05, %v391_v41 }
 0x140   :  { %v394_v44 = vmul.f32 3.051851e-05, %v392_v42 }
 0x141   :  { %v408_v45 = vsel %vm406_vm1, %v393_v43, 0.0 }
 0x142   :  { %410 = vst [vmem:[%s644_s2] sm:$0xff] %v408_v45  ;;  %v409_v46 = vsel %vm407_vm2, %v394_v44, 0.0 }
 0x143   :  { %411 = vst [vmem:[%s644_s2 + $0x8] sm:$0xff] %v409_v46 }
 0x144   :  { %416 = vsyncpa [#allocation3], 1 }

</bundles_post_ra>
